<compile_context>
chip_gen: v7x
topology: tpu7x:2x2x1
jax: 0.10.0
libtpu: 0.0.40
codegen_flags: <defaults>
</compile_context>

<pallas_src>
import math

import jax
import jax.numpy as jnp
from jax.experimental import pallas as pl
from jax.experimental.pallas import tpu as pltpu


_SQRT_2_OVER_PI = math.sqrt(2.0 / math.pi)
_FLAT_LANES = 512  # lane width used when the native last dim is not lane-friendly


def _gelu_kernel(x_ref, o_ref):
    # Upcast to f32 for the polynomial + tanh (EUP), cast back on store.
    x = x_ref[...].astype(jnp.float32)
    # x + 0.044715 * x^3 == x * (1 + 0.044715 * x*x)  (reuses x*x)
    inner = jnp.float32(_SQRT_2_OVER_PI) * x * (
        jnp.float32(1.0) + jnp.float32(0.044715) * (x * x)
    )
    y = jnp.float32(0.5) * x * (jnp.float32(1.0) + jnp.tanh(inner))
    o_ref[...] = y.astype(o_ref.dtype)


def _round_up(n: int, m: int) -> int:
    return ((n + m - 1) // m) * m


def gelu(
    x: jax.Array,
    *,
    max_block_bytes: int = 4 << 20,
    vmem_limit_bytes: int = 32 << 20,
) -> jax.Array:
    """Elementwise tanh-GELU via a row/lane-tiled, pipelined Pallas kernel."""
    if x.size == 0:
        return x

    orig_shape = x.shape
    dtype = x.dtype
    itemsize = jnp.dtype(dtype).itemsize
    # Dtype-aware sublane multiple: 8 (f32), 16 (bf16/f16), 32 (int8/fp8).
    sub_mult = max(8, 32 // itemsize)

    n_tail = None  # valid-element count when the flattened fallback path is used
    lane_ok = x.ndim >= 2 and x.shape[-1] >= 128 and x.shape[-1] % 128 == 0
    if lane_ok:
        d = x.shape[-1]
        rows = math.prod(x.shape[:-1])
        x2 = x.reshape(rows, d)
    else:
        # Awkward last dim (or 0/1-D input): flatten and retile lane-dense so the
        # output stores are unmasked full-lane writes. Pad <= sub_mult*512 elems.
        n_tail = x.size
        d = _FLAT_LANES
        n_pad = _round_up(n_tail, sub_mult * d)
        flat = x.reshape(-1)
        if n_pad != n_tail:
            flat = jnp.pad(flat, (0, n_pad - n_tail))
        rows = n_pad // d
        x2 = flat.reshape(rows, d)

    # Lane-axis blocking (only kicks in for very large last dims that would blow
    # past the block budget even at minimum row height).
    if sub_mult * d * itemsize <= max_block_bytes:
        tile_d = d
    else:
        tile_d = max(128, (max_block_bytes // (sub_mult * itemsize)) // 128 * 128)

    # Row-axis blocking: biggest sublane-aligned tile within the block budget.
    if rows <= sub_mult:
        tile_rows = rows  # full-dim block is always legal
    else:
        rows_per_block = max(
            sub_mult,
            (max_block_bytes // (tile_d * itemsize)) // sub_mult * sub_mult,
        )
        tile_rows = min(rows_per_block, _round_up(rows, sub_mult))

    grid_r = pl.cdiv(rows, tile_rows)
    grid_c = pl.cdiv(d, tile_d)
    # v7x megacore: ensure >= 2 blocks on the parallel grid when possible so both
    # TensorCores stream HBM (a single-block grid idles one core).
    if grid_r * grid_c == 1 and rows > sub_mult:
        tile_rows = _round_up(-(-rows // 2), sub_mult)
        grid_r = pl.cdiv(rows, tile_rows)

    out2 = pl.pallas_call(
        _gelu_kernel,
        out_shape=jax.ShapeDtypeStruct((rows, d), dtype),
        grid=(grid_r, grid_c),
        in_specs=[pl.BlockSpec((tile_rows, tile_d), lambda i, j: (i, j))],
        out_specs=pl.BlockSpec((tile_rows, tile_d), lambda i, j: (i, j)),
        compiler_params=pltpu.CompilerParams(
            dimension_semantics=("parallel", "parallel"),
            vmem_limit_bytes=vmem_limit_bytes,
        ),
        # TODO(synk): if a profile shows exposed DMA between steps, try
        # pipeline_mode=pl.Buffered(3) on the input spec (costs one extra block
        # of VMEM per ref; mind the v7x 64 MiB cap).
    )(x2)

    if n_tail is not None:
        return out2.reshape(-1)[:n_tail].reshape(orig_shape)
    return out2.reshape(orig_shape)


def gelu_ref(x: jax.Array) -> jax.Array:
    c = math.sqrt(2.0 / math.pi)
    xf = x.astype(jnp.float32)
    y = 0.5 * xf * (1.0 + jnp.tanh(c * (xf + 0.044715 * jnp.power(xf, 3))))
    return y.astype(x.dtype)


if __name__ == "__main__":
    key = jax.random.PRNGKey(0)

    # Shape from the module spec: torch.rand(2, 4, 768).
    x = jax.random.uniform(key, (2, 4, 768), dtype=jnp.float32)
    out = jax.block_until_ready(gelu(x))
    assert out.shape == x.shape and out.dtype == x.dtype
    assert jnp.allclose(out, gelu_ref(x), atol=1e-5, rtol=1e-5)

    # Ragged row count -> multi-block grid with a clipped (masked) final block;
    # no HBM-level pad / slice anymore.
    x2 = jax.random.normal(jax.random.PRNGKey(1), (5, 333, 768), dtype=jnp.float32)
    out2 = jax.block_until_ready(gelu(x2))
    assert jnp.allclose(out2, gelu_ref(x2), atol=1e-5, rtol=1e-5)

    # bf16 I/O (dtype-aware sublane rounding; f32 internal math).
    x3 = jax.random.normal(jax.random.PRNGKey(2), (2, 4, 768), dtype=jnp.bfloat16)
    out3 = jax.block_until_ready(gelu(x3))
    assert out3.dtype == jnp.bfloat16
    assert jnp.allclose(
        out3.astype(jnp.float32), gelu_ref(x3).astype(jnp.float32),
        atol=2e-2, rtol=2e-2,
    )

    # Awkward last dim (not a multiple of 128) -> flattened lane-dense fallback.
    x4 = jax.random.normal(jax.random.PRNGKey(3), (3, 7, 100), dtype=jnp.float32)
    out4 = jax.block_until_ready(gelu(x4))
    assert jnp.allclose(out4, gelu_ref(x4), atol=1e-5, rtol=1e-5)

    print("KERNEL_OK")
</pallas_src>

<mosaic_0001>
module attributes {stable_mosaic.version = 11 : i64} {
  func.func @_gelu_kernel(%arg0: i32, %arg1: i32, %arg2: memref<8x768xf32, #tpu.memory_space<vmem>>, %arg3: memref<8x768xf32, #tpu.memory_space<vmem>>) attributes {dimension_semantics = [#tpu.dimension_semantics<parallel>, #tpu.dimension_semantics<parallel>], iteration_bounds = array<i64: 1, 1>, scalar_prefetch = 0 : i64, scratch_operands = 0 : i64, tpu.core_type = #tpu.core_type<tc>, window_params = [{transform_indices = @transform_0, window_bounds = array<i64: 8, 768>}, {transform_indices = @transform_1, window_bounds = array<i64: 8, 768>}]} {
    %c0 = arith.constant 0 : index
    %c0_0 = arith.constant 0 : index
    %0 = vector.load %arg2[%c0, %c0_0] : memref<8x768xf32, #tpu.memory_space<vmem>>, vector<8x768xf32>
    %cst = arith.constant 0.797884583 : f32
    %1 = vector.broadcast %cst : f32 to vector<8x768xf32>
    %2 = arith.mulf %1, %0 : vector<8x768xf32>
    %3 = arith.mulf %0, %0 : vector<8x768xf32>
    %cst_1 = arith.constant 4.471500e-02 : f32
    %4 = vector.broadcast %cst_1 : f32 to vector<8x768xf32>
    %5 = arith.mulf %4, %3 : vector<8x768xf32>
    %cst_2 = arith.constant 1.000000e+00 : f32
    %6 = vector.broadcast %cst_2 : f32 to vector<8x768xf32>
    %7 = arith.addf %6, %5 : vector<8x768xf32>
    %8 = arith.mulf %2, %7 : vector<8x768xf32>
    %cst_3 = arith.constant 5.000000e-01 : f32
    %9 = vector.broadcast %cst_3 : f32 to vector<8x768xf32>
    %10 = arith.mulf %9, %0 : vector<8x768xf32>
    %11 = math.tanh %8 : vector<8x768xf32>
    %cst_4 = arith.constant 1.000000e+00 : f32
    %12 = vector.broadcast %cst_4 : f32 to vector<8x768xf32>
    %13 = arith.addf %12, %11 : vector<8x768xf32>
    %14 = arith.mulf %10, %13 : vector<8x768xf32>
    %c0_5 = arith.constant 0 : index
    %c0_6 = arith.constant 0 : index
    %15 = vector.load %arg3[%c0_5, %c0_6] : memref<8x768xf32, #tpu.memory_space<vmem>>, vector<8x768xf32>
    tpu.vector_store %arg3[%c0_5, %c0_6], %14 {strides = array<i32>} : memref<8x768xf32, #tpu.memory_space<vmem>>, vector<8x768xf32>,
    return
  }
  func.func @transform_0(%arg0: i32, %arg1: i32) -> (i32, i32) {
    %c0_i32 = arith.constant 0 : i32
    return %arg0, %arg1 : i32, i32
  }
  func.func @transform_1(%arg0: i32, %arg1: i32) -> (i32, i32) {
    %c0_i32 = arith.constant 0 : i32
    return %arg0, %arg1 : i32, i32
  }
}

</mosaic_0001>

<bundles_post_ra>
// kernel: tpu_custom_call.1
= control target key start
LH: loop header
LB: loop body
LE: loop exit
PB: predicated region body
PF: predicated region fallthrough
CT: control target
= control target key end

     0   :  { %6 = vsyncpa [#allocation3], 0  ;;  %s200_s0 = inlined_call_operand.hbm [shape: f32[8,768], index: 0, kind: input, shape index: {}]   ;;  %s201_s1 = inlined_call_operand.hbm [shape: f32[8,768], index: 1, kind: output, shape index: {}]  }
   0x1   :  { %7 = vsyncpa [#allocation4], 0  ;;  %s164_s6 = smov [#allocation2]   ;;  %s116_s10 = scalar_lea.hbm %s200_s0, 768 }
   0x2   :  { %s14_s7 = sshll.u32 %s164_s6, 4  ;;  %p117_p0 = scmp.ne.s32.totalorder %s200_s0, %s116_s10  ;;  %s15_s7 = int_to_ptr.vmem [resolvable:$true] %s14_s7 }
   0x3   :  { %p120_p1 = scmp.lt.u32.totalorder %s116_s10, %s200_s0 }
   0x5   :  { %p122_p2 = pnand %p120_p1, %p117_p0 }
   0x7   :  { %125 = shalt.err (!%p122_p2)
}
   0x8   :  { %s126_s15 = scalar_lea.vmem %s15_s7, 768  ;;  %p131_p4 = scmp.lt.s32.totalorder %s15_s7, %s15_s7 }
   0x9   :  { %p127_p3 = scmp.ne.s32.totalorder %s15_s7, %s126_s15  ;;  %p132_p5 = scmp.lt.s32.totalorder %s126_s15, %s126_s15 }
   0xb   :  { %p133_p6 = por %p132_p5, %p131_p4 }
   0xd   :  { %p134_p7 = pnand %p133_p6, %p127_p3 }
   0xf   :  { %137 = shalt.err (!%p134_p7)
}
  0x10   :  { %17 = dma.hbm_to_vmem [thread:$0]  %s200_s0, 768, %s15_s7, [#allocation3]  }
  0x11   :  { %160 = dma.done.wait [#allocation3], 768  }
  0x12   :  { %161 = vsyncadd [#allocation3], 4294966528  ;;  %v21_v0 = vld [vmem:[#allocation2] sm:$0xff]  ;;  %v22_v1 = vld [vmem:[#allocation2 + $0x8] sm:$0xff]  ;;  %s165_s0 = smov [#allocation5]  }
  0x13   :  { %v23_v2 = vld [vmem:[#allocation2 + $0x10] sm:$0xff]  ;;  %v33_v3 = vmul.f32 %v21_v0, %v21_v0  ;;  %v24_v4 = vld [vmem:[#allocation2 + $0x18] sm:$0xff]  ;;  %v27_v5 = vmul.f32 0.7978846, %v21_v0  ;;  %v34_v6 = vmul.f32 %v22_v1, %v22_v1  ;;  %v25_v8 = vld [vmem:[#allocation2 + $0x20] sm:$0xff]  ;;  %v57_v36 = vmul.f32 0.5, %v21_v0 }
  0x14   :  { %v35_v7 = vmul.f32 %v23_v2, %v23_v2  ;;  %v28_v10 = vmul.f32 0.7978846, %v22_v1  ;;  %v29_v11 = vmul.f32 0.7978846, %v23_v2  ;;  %v36_v12 = vmul.f32 %v24_v4, %v24_v4  ;;  %v26_v16 = vld [vmem:[#allocation2 + $0x28] sm:$0xff]  ;;  %s93_s18 = sshll.u32 %s165_s0, 4  ;;  %s94_s18 = int_to_ptr.vmem [resolvable:$true] %s93_s18 }
  0x15   :  { %v39_v9 = vmul.f32 0.044715, %v33_v3  ;;  %v40_v13 = vmul.f32 0.044715, %v34_v6  ;;  %v37_v15 = vmul.f32 %v25_v8, %v25_v8  ;;  %v30_v18 = vmul.f32 0.7978846, %v24_v4  ;;  %p143_p9 = scmp.lt.s32.totalorder %s94_s18, %s94_s18 }
  0x16   :  { %v41_v14 = vmul.f32 0.044715, %v35_v7  ;;  %v42_v19 = vmul.f32 0.044715, %v36_v12  ;;  %v31_v22 = vmul.f32 0.7978846, %v25_v8  ;;  %v38_v26 = vmul.f32 %v26_v16, %v26_v16 }
  0x17   :  { %v45_v17 = vadd.f32 1.0, %v39_v9  ;;  %v46_v20 = vadd.f32 1.0, %v40_v13  ;;  %v43_v23 = vmul.f32 0.044715, %v37_v15  ;;  %v32_v31 = vmul.f32 0.7978846, %v26_v16 }
  0x18   :  { %v47_v21 = vadd.f32 1.0, %v41_v14  ;;  %v48_v25 = vadd.f32 1.0, %v42_v19  ;;  %v44_v32 = vmul.f32 0.044715, %v38_v26  ;;  %v58_v38 = vmul.f32 0.5, %v22_v1  ;;  %s138_s19 = scalar_lea.vmem %s94_s18, 768 }
  0x19   :  { %v51_v24 = vmul.f32 %v45_v17, %v27_v5  ;;  %v52_v27 = vmul.f32 %v46_v20, %v28_v10  ;;  %v49_v29 = vadd.f32 1.0, %v43_v23  ;;  %v59_v41 = vmul.f32 0.5, %v23_v2  ;;  %p139_p8 = scmp.ne.s32.totalorder %s94_s18, %s138_s19  ;;  %p144_p10 = scmp.lt.s32.totalorder %s138_s19, %s138_s19 }
  0x1a   :  { %v53_v28 = vmul.f32 %v47_v21, %v29_v11  ;;  %v54_v30 = vmul.f32 %v48_v25, %v30_v18  ;;  %v50_v34 = vadd.f32 1.0, %v44_v32  ;;  %v60_v44 = vmul.f32 0.5, %v24_v4 }
  0x1b   :  { %104 = vtanh.f32 %v51_v24  ;;  %v55_v33 = vmul.f32 %v49_v29, %v31_v22  ;;  %v61_v48 = vmul.f32 0.5, %v25_v8  ;;  %v62_v54 = vmul.f32 0.5, %v26_v16  ;;  %p145_p11 = por %p144_p10, %p143_p9 }
  0x1c   :  { %106 = vtanh.f32 %v52_v27  ;;  %v56_v35 = vmul.f32 %v50_v34, %v32_v31 }
  0x1d   :  { %108 = vtanh.f32 %v53_v28  ;;  %p146_p12 = pnand %p145_p11, %p139_p8 }
  0x1e   :  { %110 = vtanh.f32 %v54_v30 }
  0x1f   :  { %112 = vtanh.f32 %v55_v33 }
  0x20   :  { %114 = vtanh.f32 %v56_v35 }
  0x25   :  { %v105_v37 = vpop.eup %104 }
  0x26   :  { %v107_v39 = vpop.eup %106  ;;  %v69_v40 = vadd.f32 1.0, %v105_v37 }
  0x27   :  { %v109_v42 = vpop.eup %108  ;;  %v70_v43 = vadd.f32 1.0, %v107_v39 }
  0x28   :  { %v111_v45 = vpop.eup %110  ;;  %v75_v46 = vmul.f32 %v69_v40, %v57_v36  ;;  %v71_v47 = vadd.f32 1.0, %v109_v42 }
  0x29   :  { %v113_v49 = vpop.eup %112  ;;  %v76_v50 = vmul.f32 %v70_v43, %v58_v38  ;;  %v72_v51 = vadd.f32 1.0, %v111_v45 }
  0x2a   :  { %81 = vst [vmem:[#allocation5] sm:$0xff] %v75_v46  ;;  %v77_v52 = vmul.f32 %v71_v47, %v59_v41  ;;  %v73_v53 = vadd.f32 1.0, %v113_v49  ;;  %v115_v55 = vpop.eup %114 }
  0x2b   :  { %82 = vst [vmem:[#allocation5 + $0x8] sm:$0xff] %v76_v50  ;;  %v78_v56 = vmul.f32 %v72_v51, %v60_v44  ;;  %v74_v58 = vadd.f32 1.0, %v115_v55 }
  0x2c   :  { %83 = vst [vmem:[#allocation5 + $0x10] sm:$0xff] %v77_v52  ;;  %v79_v57 = vmul.f32 %v73_v53, %v61_v48 }
  0x2d   :  { %84 = vst [vmem:[#allocation5 + $0x18] sm:$0xff] %v78_v56  ;;  %v80_v59 = vmul.f32 %v74_v58, %v62_v54 }
  0x2e   :  { %85 = vst [vmem:[#allocation5 + $0x20] sm:$0xff] %v79_v57 }
  0x2f   :  { %86 = vst [vmem:[#allocation5 + $0x28] sm:$0xff] %v80_v59 }
  0x30   :  { %149 = shalt.err (!%p146_p12)
}
  0x31   :  { %s150_s22 = scalar_lea.hbm %s201_s1, 768 }
  0x32   :  { %p151_p13 = scmp.ne.s32.totalorder %s201_s1, %s150_s22  ;;  %p154_p0 = scmp.lt.u32.totalorder %s150_s22, %s201_s1 }
  0x34   :  { %p156_p1 = pnand %p154_p0, %p151_p13 }
  0x36   :  { %159 = shalt.err (!%p156_p1)
}
  0x37   :  { %96 = dma.vmem_to_hbm [thread:$0]  %s94_s18, 768, %s201_s1, [#allocation4]  }
  0x38   :  { %162 = dma.done.wait [#allocation4], 768  }
  0x39   :  { %163 = vsyncadd [#allocation4], 4294966528 }
  0x3a   :  { %100 = vsyncpa [#allocation3], 1 }
  0x3b   :  { %101 = vsyncpa [#allocation4], 1 }

</bundles_post_ra>
